<compile_context>
chip_gen: v5e
topology: v5e:2x2
jax: 0.10.0
libtpu: 0.0.40
codegen_flags: <defaults>
</compile_context>

<pallas_src>
import jax
import jax.numpy as jnp
from jax.experimental import pallas as pl
from jax.experimental.pallas import tpu as pltpu

LANE = 128
SUBLANE = 8
TILE_B_CAP = 512  # rows per grid step; ~85% of HBM roofline per measurements


def _round_up(x, m):
    return ((x + m - 1) // m) * m


def critic_kernel(s_ref, a_ref, w1s_ref, w1a_ref, b1_ref,
                  w2_ref, b2_ref, wq_ref, bq_ref, q_ref):
    # fc1 with the concat fused as a split matmul (bf16 operands, f32 accum):
    #   concat([s, a]) @ w1 == s @ w1[:Ks] + a @ w1[Ks:]
    h1 = jnp.dot(s_ref[...], w1s_ref[...], preferred_element_type=jnp.float32)
    h1 = h1 + jnp.dot(a_ref[...], w1a_ref[...],
                      preferred_element_type=jnp.float32)
    h1 = jnp.maximum(h1 + b1_ref[...], 0.0)          # bias + ReLU in f32

    # fc2 + ReLU (padded lanes stay exactly zero).
    h2 = jnp.dot(h1.astype(jnp.bfloat16), w2_ref[...],
                 preferred_element_type=jnp.float32)
    h2 = jnp.maximum(h2 + b2_ref[...], 0.0)

    # q head: VPU multiply with broadcast wq row + XLU lane reduction.
    # Output block is (tile_b, 1): HBM writeback is 4 B/row instead of 512 B.
    q = jnp.sum(h2 * wq_ref[...], axis=-1, keepdims=True)
    q_ref[...] = q + bq_ref[...]


def init_params(key, input_dims, fc1_dims, fc2_dims, num_agent, action_dim):
    """PyTorch nn.Linear-style init (uniform +-1/sqrt(fan_in)), unpadded."""
    total_input_dims = input_dims + num_agent * action_dim
    ks = jax.random.split(key, 6)

    def linear(kw, kb, fan_in, fan_out):
        bound = 1.0 / jnp.sqrt(jnp.float32(fan_in))
        w = jax.random.uniform(kw, (fan_in, fan_out), jnp.float32, -bound, bound)
        b = jax.random.uniform(kb, (1, fan_out), jnp.float32, -bound, bound)
        return w, b

    w1, b1 = linear(ks[0], ks[1], total_input_dims, fc1_dims)
    w2, b2 = linear(ks[2], ks[3], fc1_dims, fc2_dims)
    wq, bq = linear(ks[4], ks[5], fc2_dims, 1)
    return (w1, b1, w2, b2, wq, bq)


def prepare_padded_params(params, input_dims, num_agent, action_dim):
    """One-time host-side lane padding + bf16 cast of the MXU operands."""
    w1, b1, w2, b2, wq, bq = params
    ks_dim = input_dims
    ka_dim = num_agent * action_dim
    f1 = w1.shape[1]
    f2 = w2.shape[1]
    f1p = _round_up(f1, LANE)
    f2p = _round_up(f2, LANE)

    w1s = jnp.zeros((ks_dim, f1p), jnp.float32).at[:, :f1].set(w1[:ks_dim, :])
    w1a = jnp.zeros((ka_dim, f1p), jnp.float32).at[:, :f1].set(w1[ks_dim:, :])
    b1p = jnp.zeros((1, f1p), jnp.float32).at[:, :f1].set(b1.reshape(1, f1))
    w2p = jnp.zeros((f1p, f2p), jnp.float32).at[:f1, :f2].set(w2)
    b2p = jnp.zeros((1, f2p), jnp.float32).at[:, :f2].set(b2.reshape(1, f2))
    wqr = jnp.zeros((1, f2p), jnp.float32).at[:, :f2].set(wq.reshape(1, f2))
    bqp = bq.reshape(1, 1).astype(jnp.float32)

    # bf16 for the matmul operands only; biases / head row stay f32.
    return (w1s.astype(jnp.bfloat16), w1a.astype(jnp.bfloat16), b1p,
            w2p.astype(jnp.bfloat16), b2p, wqr, bqp)


def critic_forward(state, action, padded_params):
    """Equivalent to CriticNetwork.forward(state, action); returns (B, 1) f32."""
    w1s, w1a, b1p, w2p, b2p, wqr, bqp = padded_params
    assert state.shape[0] == action.shape[0], "Batch sizes must match"
    assert state.shape[1] == w1s.shape[0], "State dims must match input dims"
    assert action.shape[1] == w1a.shape[0], "Action dims must match"

    batch = state.shape[0]
    ks_dim = state.shape[1]
    ka_dim = action.shape[1]
    f1p = w2p.shape[0]
    f2p = w2p.shape[1]

    # bf16 inputs halve input HBM traffic; matmuls accumulate in f32.
    state = state.astype(jnp.bfloat16)
    action = action.astype(jnp.bfloat16)

    # Batch tiling: big tiles (up to 512 rows), and always >= 2 grid steps when
    # the padded batch allows it so both v7x TensorCores are used.
    b8 = _round_up(batch, SUBLANE)
    if b8 <= TILE_B_CAP:
        if b8 >= 2 * SUBLANE:
            tile_b = _round_up((b8 + 1) // 2, SUBLANE)
            b_pad = 2 * tile_b
        else:
            tile_b = b8
            b_pad = b8
    else:
        tile_b = TILE_B_CAP
        b_pad = _round_up(batch, tile_b)

    if b_pad != batch:
        state = jnp.pad(state, ((0, b_pad - batch), (0, 0)))
        action = jnp.pad(action, ((0, b_pad - batch), (0, 0)))

    grid = (b_pad // tile_b,)

    def full_spec(arr):
        # Whole lane-padded parameter resident in VMEM; constant block index
        # across the batch grid so it is not re-fetched per step.
        return pl.BlockSpec(arr.shape, lambda i: (0, 0))

    flops = 2 * b_pad * ((ks_dim + ka_dim) * f1p + f1p * f2p + f2p)
    bytes_accessed = (
        b_pad * (ks_dim + ka_dim) * 2                 # bf16 inputs
        + ((ks_dim + ka_dim) * f1p + f1p * f2p) * 2   # bf16 weights
        + (f1p + 2 * f2p + 1) * 4                     # f32 biases + wq row
        + b_pad * 4                                   # f32 q output (1 lane/row)
    )

    q = pl.pallas_call(
        critic_kernel,
        out_shape=jax.ShapeDtypeStruct((b_pad, 1), jnp.float32),
        grid=grid,
        in_specs=[
            pl.BlockSpec((tile_b, ks_dim), lambda i: (i, 0)),
            pl.BlockSpec((tile_b, ka_dim), lambda i: (i, 0)),
            full_spec(w1s), full_spec(w1a), full_spec(b1p),
            full_spec(w2p), full_spec(b2p),
            full_spec(wqr), full_spec(bqp),
        ],
        out_specs=pl.BlockSpec((tile_b, 1), lambda i: (i, 0)),
        compiler_params=pltpu.CompilerParams(
            dimension_semantics=("parallel",)),
        cost_estimate=pl.CostEstimate(
            flops=int(flops), transcendentals=0,
            bytes_accessed=int(bytes_accessed)),
    )(state, action, w1s, w1a, b1p, w2p, b2p, wqr, bqp)

    return q[:batch, :]


if __name__ == "__main__":
    input_dims = 16
    fc1_dims = 32
    fc2_dims = 32
    num_agent = 2
    action_dim = 4

    key = jax.random.PRNGKey(0)
    k_params, k_data = jax.random.split(key)

    params = init_params(k_params, input_dims, fc1_dims, fc2_dims,
                         num_agent, action_dim)
    padded_params = prepare_padded_params(params, input_dims, num_agent,
                                          action_dim)
    w1, b1, w2, b2, wq, bq = params

    def reference(state, action):
        x = jnp.concatenate([state, action], axis=1)
        h1 = jnp.maximum(x @ w1 + b1, 0.0)
        h2 = jnp.maximum(h1 @ w2 + b2, 0.0)
        return h2 @ wq + bq

    # batch=8 exercises the single-tile path; batch=20 exercises the 2-step
    # grid (v7x dual-TC sharding) plus batch padding/slicing.
    for batch in (8, 20):
        ks, ka = jax.random.split(jax.random.fold_in(k_data, batch))
        state = jax.random.normal(ks, (batch, input_dims), jnp.float32)
        action = jax.random.normal(
            ka, (batch, num_agent * action_dim), jnp.float32)

        q = jax.block_until_ready(critic_forward(state, action, padded_params))
        q_ref = reference(state, action)

        assert q.shape == (batch, 1)
        # bf16 MXU operands (f32 accumulation) -> small drift vs f32 reference.
        assert jnp.allclose(q, q_ref, atol=5e-2, rtol=5e-2), (
            float(jnp.max(jnp.abs(q - q_ref))))

    print("KERNEL_OK")
</pallas_src>

<mosaic_0001>
module attributes {stable_mosaic.version = 11 : i64} {
  func.func @critic_kernel(%arg0: i32, %arg1: memref<8x16xbf16, #tpu.memory_space<vmem>>, %arg2: memref<8x8xbf16, #tpu.memory_space<vmem>>, %arg3: memref<16x128xbf16, #tpu.memory_space<vmem>>, %arg4: memref<8x128xbf16, #tpu.memory_space<vmem>>, %arg5: memref<1x128xf32, #tpu.memory_space<vmem>>, %arg6: memref<128x128xbf16, #tpu.memory_space<vmem>>, %arg7: memref<1x128xf32, #tpu.memory_space<vmem>>, %arg8: memref<1x128xf32, #tpu.memory_space<vmem>>, %arg9: memref<1x1xf32, #tpu.memory_space<vmem>>, %arg10: memref<8x1xf32, #tpu.memory_space<vmem>>) attributes {dimension_semantics = [#tpu.dimension_semantics<parallel>], iteration_bounds = array<i64: 1>, scalar_prefetch = 0 : i64, scratch_operands = 0 : i64, tpu.core_type = #tpu.core_type<tc>, window_params = [{transform_indices = @transform_0, window_bounds = array<i64: 8, 16>}, {transform_indices = @transform_1, window_bounds = array<i64: 8, 8>}, {pipeline_mode = #tpu.pipeline_mode<synchronous>, transform_indices = @transform_2, window_bounds = array<i64: 16, 128>}, {pipeline_mode = #tpu.pipeline_mode<synchronous>, transform_indices = @transform_3, window_bounds = array<i64: 8, 128>}, {pipeline_mode = #tpu.pipeline_mode<synchronous>, transform_indices = @transform_4, window_bounds = array<i64: 1, 128>}, {pipeline_mode = #tpu.pipeline_mode<synchronous>, transform_indices = @transform_5, window_bounds = array<i64: 128, 128>}, {pipeline_mode = #tpu.pipeline_mode<synchronous>, transform_indices = @transform_6, window_bounds = array<i64: 1, 128>}, {pipeline_mode = #tpu.pipeline_mode<synchronous>, transform_indices = @transform_7, window_bounds = array<i64: 1, 128>}, {pipeline_mode = #tpu.pipeline_mode<synchronous>, transform_indices = @transform_8, window_bounds = array<i64: 1, 1>}, {transform_indices = @transform_9, window_bounds = array<i64: 8, 1>}]} {
    %c0 = arith.constant 0 : index
    %c0_0 = arith.constant 0 : index
    %0 = vector.load %arg1[%c0, %c0_0] : memref<8x16xbf16, #tpu.memory_space<vmem>>, vector<8x16xbf16>
    %c0_1 = arith.constant 0 : index
    %c0_2 = arith.constant 0 : index
    %1 = vector.load %arg3[%c0_1, %c0_2] : memref<16x128xbf16, #tpu.memory_space<vmem>>, vector<16x128xbf16>
    %cst = arith.constant dense<0.000000e+00> : vector<8x128xf32>
    %2 = tpu.matmul %0, %1, %cst {dimension_numbers = #tpu.dot_dimension_numbers<[1], [0], [0], [1], [0, 0, 1, 1], [], []>} : vector<8x16xbf16>, vector<16x128xbf16>, vector<8x128xf32> -> vector<8x128xf32>
    %c0_3 = arith.constant 0 : index
    %c0_4 = arith.constant 0 : index
    %3 = vector.load %arg2[%c0_3, %c0_4] : memref<8x8xbf16, #tpu.memory_space<vmem>>, vector<8x8xbf16>
    %c0_5 = arith.constant 0 : index
    %c0_6 = arith.constant 0 : index
    %4 = vector.load %arg4[%c0_5, %c0_6] : memref<8x128xbf16, #tpu.memory_space<vmem>>, vector<8x128xbf16>
    %cst_7 = arith.constant dense<0.000000e+00> : vector<8x128xf32>
    %5 = tpu.matmul %3, %4, %cst_7 {dimension_numbers = #tpu.dot_dimension_numbers<[1], [0], [0], [1], [0, 0, 1, 1], [], []>} : vector<8x8xbf16>, vector<8x128xbf16>, vector<8x128xf32> -> vector<8x128xf32>
    %6 = arith.addf %2, %5 : vector<8x128xf32>
    %c0_8 = arith.constant 0 : index
    %c0_9 = arith.constant 0 : index
    %7 = vector.load %arg5[%c0_8, %c0_9] : memref<1x128xf32, #tpu.memory_space<vmem>>, vector<1x128xf32>
    %8 = vector.broadcast %7 : vector<1x128xf32> to vector<8x128xf32>
    %9 = arith.addf %6, %8 : vector<8x128xf32>
    %cst_10 = arith.constant 0.000000e+00 : f32
    %10 = vector.broadcast %cst_10 : f32 to vector<8x128xf32>
    %11 = arith.maximumf %9, %10 : vector<8x128xf32>
    %12 = arith.truncf %11 : vector<8x128xf32> to vector<8x128xbf16>
    %c0_11 = arith.constant 0 : index
    %c0_12 = arith.constant 0 : index
    %13 = vector.load %arg6[%c0_11, %c0_12] : memref<128x128xbf16, #tpu.memory_space<vmem>>, vector<128x128xbf16>
    %cst_13 = arith.constant dense<0.000000e+00> : vector<8x128xf32>
    %14 = tpu.matmul %12, %13, %cst_13 {dimension_numbers = #tpu.dot_dimension_numbers<[1], [0], [0], [1], [0, 0, 1, 1], [], []>} : vector<8x128xbf16>, vector<128x128xbf16>, vector<8x128xf32> -> vector<8x128xf32>
    %c0_14 = arith.constant 0 : index
    %c0_15 = arith.constant 0 : index
    %15 = vector.load %arg7[%c0_14, %c0_15] : memref<1x128xf32, #tpu.memory_space<vmem>>, vector<1x128xf32>
    %16 = vector.broadcast %15 : vector<1x128xf32> to vector<8x128xf32>
    %17 = arith.addf %14, %16 : vector<8x128xf32>
    %cst_16 = arith.constant 0.000000e+00 : f32
    %18 = vector.broadcast %cst_16 : f32 to vector<8x128xf32>
    %19 = arith.maximumf %17, %18 : vector<8x128xf32>
    %c0_17 = arith.constant 0 : index
    %c0_18 = arith.constant 0 : index
    %20 = vector.load %arg8[%c0_17, %c0_18] : memref<1x128xf32, #tpu.memory_space<vmem>>, vector<1x128xf32>
    %21 = vector.broadcast %20 : vector<1x128xf32> to vector<8x128xf32>
    %22 = arith.mulf %19, %21 : vector<8x128xf32>
    %cst_19 = arith.constant dense<0.000000e+00> : vector<8xf32>
    %23 = vector.multi_reduction <add>, %22, %cst_19 [1] : vector<8x128xf32> to vector<8xf32>
    %24 = vector.shape_cast %23 : vector<8xf32> to vector<8x1xf32>
    %c0_20 = arith.constant 0 : index
    %c0_21 = arith.constant 0 : index
    %25 = vector.load %arg9[%c0_20, %c0_21] : memref<1x1xf32, #tpu.memory_space<vmem>>, vector<1x1xf32>
    %26 = vector.broadcast %25 : vector<1x1xf32> to vector<8x1xf32>
    %27 = arith.addf %24, %26 : vector<8x1xf32>
    %c0_22 = arith.constant 0 : index
    %c0_23 = arith.constant 0 : index
    %28 = vector.load %arg10[%c0_22, %c0_23] : memref<8x1xf32, #tpu.memory_space<vmem>>, vector<8x1xf32>
    tpu.vector_store %arg10[%c0_22, %c0_23], %27 {strides = array<i32>} : memref<8x1xf32, #tpu.memory_space<vmem>>, vector<8x1xf32>,
    return
  }
  func.func @transform_0(%arg0: i32) -> (i32, i32) {
    %c0_i32 = arith.constant 0 : i32
    %c0_i32_0 = arith.constant 0 : i32
    return %arg0, %c0_i32 : i32, i32
  }
  func.func @transform_1(%arg0: i32) -> (i32, i32) {
    %c0_i32 = arith.constant 0 : i32
    %c0_i32_0 = arith.constant 0 : i32
    return %arg0, %c0_i32 : i32, i32
  }
  func.func @transform_2(%arg0: i32) -> (i32, i32) {
    %c0_i32 = arith.constant 0 : i32
    %c0_i32_0 = arith.constant 0 : i32
    %c0_i32_1 = arith.constant 0 : i32
    return %c0_i32, %c0_i32_0 : i32, i32
  }
  func.func @transform_3(%arg0: i32) -> (i32, i32) {
    %c0_i32 = arith.constant 0 : i32
    %c0_i32_0 = arith.constant 0 : i32
    %c0_i32_1 = arith.constant 0 : i32
    return %c0_i32, %c0_i32_0 : i32, i32
  }
  func.func @transform_4(%arg0: i32) -> (i32, i32) {
    %c0_i32 = arith.constant 0 : i32
    %c0_i32_0 = arith.constant 0 : i32
    %c0_i32_1 = arith.constant 0 : i32
    return %c0_i32, %c0_i32_0 : i32, i32
  }
  func.func @transform_5(%arg0: i32) -> (i32, i32) {
    %c0_i32 = arith.constant 0 : i32
    %c0_i32_0 = arith.constant 0 : i32
    %c0_i32_1 = arith.constant 0 : i32
    return %c0_i32, %c0_i32_0 : i32, i32
  }
  func.func @transform_6(%arg0: i32) -> (i32, i32) {
    %c0_i32 = arith.constant 0 : i32
    %c0_i32_0 = arith.constant 0 : i32
    %c0_i32_1 = arith.constant 0 : i32
    return %c0_i32, %c0_i32_0 : i32, i32
  }
  func.func @transform_7(%arg0: i32) -> (i32, i32) {
    %c0_i32 = arith.constant 0 : i32
    %c0_i32_0 = arith.constant 0 : i32
    %c0_i32_1 = arith.constant 0 : i32
    return %c0_i32, %c0_i32_0 : i32, i32
  }
  func.func @transform_8(%arg0: i32) -> (i32, i32) {
    %c0_i32 = arith.constant 0 : i32
    %c0_i32_0 = arith.constant 0 : i32
    %c0_i32_1 = arith.constant 0 : i32
    return %c0_i32, %c0_i32_0 : i32, i32
  }
  func.func @transform_9(%arg0: i32) -> (i32, i32) {
    %c0_i32 = arith.constant 0 : i32
    %c0_i32_0 = arith.constant 0 : i32
    return %arg0, %c0_i32 : i32, i32
  }
}

</mosaic_0001>

<bundles_post_ra>
// kernel: tpu_custom_call.1
= control target key start
LH: loop header
LB: loop body
LE: loop exit
PB: predicated region body
PF: predicated region fallthrough
CT: control target
= control target key end

     0   :  { %s498_s0 = inlined_call_operand.hbm [shape: bf16[8,16], index: 0, kind: input, shape index: {}]   ;;  %s499_s1 = inlined_call_operand.hbm [shape: bf16[8,8], index: 1, kind: input, shape index: {}]   ;;  %s500_s2 = inlined_call_operand.hbm [shape: bf16[16,128], index: 2, kind: input, shape index: {}]   ;;  %s501_s3 = inlined_call_operand.vmem [shape: bf16[8,128], index: 3, kind: input, shape index: {}]   ;;  %s502_s4 = inlined_call_operand.vmem [shape: f32[1,128], index: 4, kind: input, shape index: {}]   ;;  %s503_s5 = inlined_call_operand.hbm [shape: bf16[128,128], index: 5, kind: input, shape index: {}]   ;;  %s504_s6 = inlined_call_operand.vmem [shape: f32[1,128], index: 6, kind: input, shape index: {}]   ;;  %s505_s7 = inlined_call_operand.vmem [shape: f32[1,128], index: 7, kind: input, shape index: {}]   ;;  %s506_s8 = inlined_call_operand.<no memory space> [shape: f32[1,1], index: 8, kind: input, shape index: {}]   ;;  %s507_s9 = inlined_call_operand.vmem [shape: f32[8,1], index: 9, kind: output, shape index: {}]  }
   0x1   :  { %v14_v0 = vstv %s506_s8 }
   0x2   :  { %15 = vst [vmem:[#allocation2] sm:$0x1] %v14_v0 }
   0x3   :  { %16 = vsyncpa [#allocation4], 0 }
   0x4   :  { %17 = vsyncpa [#allocation6], 0  ;;  %s35_s13 = sshll.u32 %s499_s1, 4  ;;  %s36_s13 = int_to_ptr.hbm [resolvable:$true] %s35_s13 }
   0x5   :  { %18 = vsyncpa [#allocation9], 0  ;;  %s412_s14 = smov [#allocation5]   ;;  %s24_s18 = sshll.u32 %s498_s0, 4  ;;  %s25_s18 = int_to_ptr.hbm [resolvable:$true] %s24_s18 }
   0x6   :  { %s37_s15 = sshll.u32 %s412_s14, 4  ;;  %s413_s19 = smov [#allocation3]   ;;  %s38_s15 = int_to_ptr.vmem [resolvable:$true] %s37_s15 }
   0x7   :  { %40 = dma.hbm_to_vmem [thread:$0]  %s36_s13, 64, %s38_s15, [#allocation6]  }
   0x8   :  { %s26_s8 = sshll.u32 %s413_s19, 4  ;;  %s45_s22 = sshll.u32 %s500_s2, 4  ;;  %s27_s8 = int_to_ptr.vmem [resolvable:$true] %s26_s8  ;;  %s46_s22 = int_to_ptr.hbm [resolvable:$true] %s45_s22 }
   0x9   :  { %29 = dma.hbm_to_vmem [thread:$0]  %s25_s18, 64, %s27_s8, [#allocation4]  }
   0xa   :  { %s414_s1 = smov [#allocation7]   ;;  %s62_s26 = sshll.u32 %s503_s5, 4  ;;  %s63_s26 = int_to_ptr.hbm [resolvable:$true] %s62_s26 }
   0xb   :  { %s47_s23 = sshll.u32 %s414_s1, 4  ;;  %s415_s27 = smov 64   ;;  %s48_s23 = int_to_ptr.vmem [resolvable:$true] %s47_s23 }
   0xc   :  { %s416_s0 = smov 4   ;;  %s417_s28 = smov [#allocation8]  }
   0xd   :  { %53 = dma.hbm_to_vmem [thread:$0]  %s46_s22, 128, %s48_s23, [#allocation6], %s415_s27, %s415_s27, %s416_s0  }
   0xe   :  { %s64_s29 = sshll.u32 %s417_s28, 4  ;;  %s65_s29 = int_to_ptr.vmem [resolvable:$true] %s64_s29 }
   0xf   :  { %70 = dma.hbm_to_vmem [thread:$0]  %s63_s26, 1024, %s65_s29, [#allocation9], %s415_s27, %s415_s27, %s416_s0  }
  0x10   :  { %406 = dma.done.wait [#allocation4], 64  }
  0x11   :  { %407 = vsyncadd [#allocation4], 4294967232 }
  0x12   :  { %408 = dma.done.wait [#allocation6], 192  }
  0x13   :  { %409 = vsyncadd [#allocation6], 4294967104 }
  0x14   :  { %410 = dma.done.wait [#allocation9], 1024  }
  0x15   :  { %411 = vsyncadd [#allocation9], 4294966272  ;;  %vm103_vm0 = vcmask 1043456   ;;  %v98_v1 = vld [vmem:[%s501_s3] sm:$0xf]  ;;  %v291_v2 = vld [vmem:[#allocation7] sm:$0xff] }
  0x16   :  { %v105_v3 = vsel %vm103_vm0, %v98_v1, 0  ;;  %v299_v4 = vld [vmem:[#allocation8 + $0x38] sm:$0xff]  ;;  %137 = vmatpush.bf16.msra.mxu1 %v291_v2  ;;  %v97_v5 = vld [vmem:[#allocation5] sm:$0xf]  ;;  %vm99_vm1 = vcmask 64512   ;;  %vm126_vm2 = vcmask 130048  }
  0x17   :  { %114 = vmatpush.bf16.msra.mxu0 %v105_v3  ;;  %v94_v6 = vld [vmem:[#allocation3] sm:$0xf]  ;;  %218 = vmatpush.bf16.msra.mxu2 %v299_v4  ;;  %v297_v8 = vld [vmem:[#allocation8 + $0x28] sm:$0xff]  ;;  %v296_v9 = vld [vmem:[#allocation8 + $0x20] sm:$0xff]  ;;  %vm244_vm3 = vcmask 7168  }
  0x18   :  { %v298_v7 = vld [vmem:[#allocation8 + $0x30] sm:$0xff]  ;;  %v295_v10 = vld [vmem:[#allocation8 + $0x18] sm:$0xff]  ;;  %v293_v12 = vld [vmem:[#allocation8 + $0x8] sm:$0xff] }
  0x19   :  { %258 = vmatmul.msk.bf16.vlgmr.msra.gmra.mxu1 %vm126_vm2, %v94_v6  ;;  %v294_v11 = vld [vmem:[#allocation8 + $0x10] sm:$0xff]  ;;  %v292_v13 = vld [vmem:[#allocation8] sm:$0xff]  ;;  %v306_v14 = vld [vmem:[%s502_s4] ss:$0 sm:$0xff] }
  0x1a   :  { %253 = vmatmul.msk.bf16.vlgmr.msra.gmra.mxu0 %vm99_vm1, %v97_v5  ;;  %v307_v23 = vld [vmem:[%s504_s6] ss:$0 sm:$0xff] }
  0x1b   :  { %219 = vmatpush.bf16.msra.mxu2 %v298_v7  ;;  %v308_v26 = vld [vmem:[%s505_s7] ss:$0 sm:$0xff] }
  0x1c   :  { %v309_v30 = vld [vmem:[#allocation2] ss:$0 sm:$0xff] }
  0x1f   :  { %220 = vmatpush.bf16.msra.mxu2 %v297_v8 }
  0x23   :  { %221 = vmatpush.bf16.msra.mxu2 %v296_v9 }
  0x27   :  { %222 = vmatpush.bf16.msra.mxu2 %v295_v10 }
  0x2b   :  { %223 = vmatpush.bf16.msra.mxu2 %v294_v11 }
  0x2f   :  { %224 = vmatpush.bf16.msra.mxu2 %v293_v12 }
  0x33   :  { %225 = vmatpush.bf16.msra.mxu2 %v292_v13 }
  0x96   :  { %v139_v16 = vpop.f32.mrf.mxu1 }
  0x97   :  { %v116_v15 = vpop.f32.mrf.mxu0 }
  0x98   :  { %v140_v17 = vadd.f32 %v139_v16, %v116_v15 }
  0x9a   :  { %v147_v18 = vadd.f32 %v306_v14, %v140_v17 }
  0x9c   :  { %v148_v19 = vmax.f32 %v147_v18, 0.0 }
  0x9e   :  { %v149_v20 = vpack.c.bf16 %v148_v19, %v148_v19  ;;  %v141_v22 = vpop.f32.mrf.mxu1 }
  0x9f   :  { %v118_v21 = vpop.f32.mrf.mxu0 }
  0xa0   :  { %226 = vmatmul.bf16.vlgmr.msra.gmra.mxu2 %v149_v20 }
 0x123   :  { %v227_v24 = vpop.f32.mrf.mxu2 }
 0x124   :  { %v228_v25 = vadd.f32 %v307_v23, %v227_v24 }
 0x126   :  { %v231_v27 = vmax.f32 %v228_v25, 0.0 }
 0x128   :  { %v236_v28 = vmul.f32 %v308_v26, %v231_v27 }
 0x12a   :  { %237 = vadd.xlane.f32.xlu0 %v236_v28 }
 0x12b   :  { %v229_v29 = vpop.f32.mrf.mxu2 }
 0x19d   :  { %v238_v31 = vpop.xlane.xlu0 %237 }
 0x19e   :  { %v243_v32 = vadd.f32 %v309_v30, %v238_v31 }
 0x1a0   :  { %245 = vst.msk [vmem:[%s507_s9] sm:$0xff] %vm244_vm3, %v243_v32 }
 0x1a1   :  { %250 = vsyncpa [#allocation4], 1 }
 0x1a2   :  { %251 = vsyncpa [#allocation6], 1 }
 0x1a3   :  { %252 = vsyncpa [#allocation9], 1 }

</bundles_post_ra>
